<compile_context>
chip_gen: v6e
topology: v6e:2x2x1
jax: 0.10.0
libtpu: 0.0.40
codegen_flags: <defaults>
</compile_context>

<pallas_src>
import functools

import jax
import jax.numpy as jnp
from jax.experimental import pallas as pl
from jax.experimental.pallas import tpu as pltpu

LANE = 128
SUBLANE = 8
SMOOTH = 1e-5


def _cdiv(a, b):
    return (a + b - 1) // b


def _dice_partials_kernel(score_ref, target_ref, out_ref, *,
                          n_classes, r_total, r_tile, fuse_softmax,
                          mask_pad, mask_rows):
    """Accumulate per-class [intersect, y_sum, z_sum] partial sums.

    score_ref  : VMEM (1, C, R_TILE, 128)  float  (batch b, row tile m)
    target_ref : VMEM (1, R_TILE, 128)     int32  (batch b, row tile m)
    out_ref    : VMEM (1, 3, C, 8, 128)    f32    resident accumulator per b
    """
    m = pl.program_id(1)

    @pl.when(m == 0)
    def _():
        out_ref[...] = jnp.zeros_like(out_ref)

    s = score_ref[0].astype(jnp.float32)           # (C, R_TILE, 128)
    t = target_ref[0]                              # (R_TILE, 128) int32

    if fuse_softmax:
        # Per-pixel softmax over the class axis (leading, non-tiled dim).
        s_max = jnp.max(s, axis=0, keepdims=True)
        e = jnp.exp(s - s_max)                     # exp -> EUP slot
        s = e / jnp.sum(e, axis=0, keepdims=True)

    # Validity mask: HW padding carries the sentinel label == n_classes; a
    # ragged last row-tile may contain garbage rows beyond r_total.
    valid = None
    if mask_rows:
        row = jax.lax.broadcasted_iota(jnp.int32, (r_tile, LANE), 0)
        valid = (m * r_tile + row) < r_total
    if mask_pad:
        pad_ok = jnp.logical_and(t >= 0, t < n_classes)
        valid = pad_ok if valid is None else jnp.logical_and(valid, pad_ok)

    cls = jax.lax.broadcasted_iota(jnp.int32, (n_classes, r_tile, LANE), 0)
    onehot = t[None, :, :] == cls                  # (C, R_TILE, 128) bool
    if valid is not None:
        vb = valid[None, :, :]
        onehot = jnp.logical_and(onehot, vb)
        s = jnp.where(vb, s, 0.0)

    k = r_tile // SUBLANE

    def part(x):
        # (C, R_TILE, 128) -> (C, 8, 128): sublane-group sum = pure vreg adds,
        # no in-kernel cross-lane reduction.
        return x.reshape(n_classes, k, SUBLANE, LANE).sum(axis=1)

    out_ref[0, 0] += part(jnp.where(onehot, s, 0.0))     # intersect
    out_ref[0, 1] += part(onehot.astype(jnp.float32))    # y_sum  (t*t == t)
    out_ref[0, 2] += part(s * s)                         # z_sum


def dice_loss(inputs, target, weight=None, softmax=False):
    """Pallas equivalent of DiceLoss(C).forward(inputs, target, weight, softmax)."""
    B, C, H, W = inputs.shape
    assert target.shape == (B, H, W), "target must be (B, H, W) integer labels"

    if inputs.dtype == jnp.float64:
        inputs = inputs.astype(jnp.float32)

    HW = H * W
    blk = SUBLANE * LANE                        # 1024: minimal (8,128) layout unit
    HW_pad = _cdiv(HW, blk) * blk

    x = inputs.reshape(B, C, HW)                # free (contiguous) — no transpose
    t = target.reshape(B, HW).astype(jnp.int32)
    if HW_pad != HW:
        x = jnp.pad(x, ((0, 0), (0, 0), (0, HW_pad - HW)))
        t = jnp.pad(t, ((0, 0), (0, HW_pad - HW)), constant_values=C)  # sentinel

    R = HW_pad // LANE                          # multiple of 8
    # Row-tile: aim for a ~2 MiB (f32-equivalent) score block, 8-row aligned.
    budget_rows = max(SUBLANE, (2 * 1024 * 1024) // (C * LANE * 4))
    R_TILE = max(SUBLANE, min(R, 1024, (budget_rows // SUBLANE) * SUBLANE))
    n_tiles = _cdiv(R, R_TILE)

    score4 = x.reshape(B, C, R, LANE)           # free split of last dim
    target3 = t.reshape(B, R, LANE)

    kernel = functools.partial(
        _dice_partials_kernel,
        n_classes=C, r_total=R, r_tile=R_TILE, fuse_softmax=bool(softmax),
        mask_pad=(HW_pad != HW), mask_rows=(R % R_TILE != 0))

    partials = pl.pallas_call(
        kernel,
        out_shape=jax.ShapeDtypeStruct((B, 3, C, SUBLANE, LANE), jnp.float32),
        grid=(B, n_tiles),
        in_specs=[
            pl.BlockSpec((1, C, R_TILE, LANE), lambda b, m: (b, 0, m, 0)),
            pl.BlockSpec((1, R_TILE, LANE), lambda b, m: (b, m, 0)),
        ],
        out_specs=pl.BlockSpec((1, 3, C, SUBLANE, LANE),
                               lambda b, m: (b, 0, 0, 0, 0)),
        compiler_params=pltpu.CompilerParams(
            dimension_semantics=("parallel", "arbitrary")),
    )(score4, target3)

    # Tiny final reduction + dice combine + class weighting in plain JAX.
    sums = jnp.sum(partials, axis=(0, 3, 4))    # (3, C)
    intersect, y_sum, z_sum = sums[0], sums[1], sums[2]
    dice = (2.0 * intersect + SMOOTH) / (z_sum + y_sum + SMOOTH)

    if weight is None:
        weight = jnp.ones((C,), jnp.float32)
    else:
        weight = jnp.asarray(weight, jnp.float32)
    return jnp.sum((1.0 - dice) * weight) / C


def dice_loss_ref(inputs, target, weight=None, softmax=False):
    """Pure-JAX reference mirroring the PyTorch module exactly."""
    C = inputs.shape[1]
    if softmax:
        inputs = jax.nn.softmax(inputs, axis=1)
    if weight is None:
        weight = [1.0] * C
    onehot = (target[:, None] == jnp.arange(C)[None, :, None, None]).astype(jnp.float32)
    loss = 0.0
    for i in range(C):
        s = inputs[:, i].astype(jnp.float32)
        tt = onehot[:, i]
        intersect = jnp.sum(s * tt)
        y_sum = jnp.sum(tt * tt)
        z_sum = jnp.sum(s * s)
        dice = (2.0 * intersect + SMOOTH) / (z_sum + y_sum + SMOOTH)
        loss = loss + (1.0 - dice) * weight[i]
    return loss / C


if __name__ == "__main__":
    B, C, H, W = 2, 4, 16, 16
    key = jax.random.PRNGKey(0)
    k1, k2, k3 = jax.random.split(key, 3)
    logits = jax.random.normal(k1, (B, C, H, W), dtype=jnp.float32)
    target = jax.random.randint(k2, (B, H, W), 0, C, dtype=jnp.int32)

    # softmax=True path: channel softmax fused inside the kernel.
    loss = dice_loss(logits, target, weight=None, softmax=True)
    loss = jax.block_until_ready(loss)
    ref = dice_loss_ref(logits, target, weight=None, softmax=True)
    assert jnp.allclose(loss, ref, atol=1e-5, rtol=1e-5), (loss, ref)

    # softmax=False path with per-class weights and a spatial size (20x20)
    # that exercises the in-kernel padding mask.
    probs = jax.random.uniform(k3, (B, C, 20, 20), dtype=jnp.float32)
    target2 = jax.random.randint(k2, (B, 20, 20), 0, C, dtype=jnp.int32)
    w = [0.5, 1.0, 2.0, 1.5]
    loss2 = jax.block_until_ready(dice_loss(probs, target2, weight=w, softmax=False))
    ref2 = dice_loss_ref(probs, target2, weight=w, softmax=False)
    assert jnp.allclose(loss2, ref2, atol=1e-5, rtol=1e-5), (loss2, ref2)

    print("KERNEL_OK")
</pallas_src>

<mosaic_0001>
module attributes {stable_mosaic.version = 11 : i64} {
  func.func @_dice_partials_kernel(%arg0: i32, %arg1: i32, %arg2: memref<1x4x8x128xf32, #tpu.memory_space<vmem>>, %arg3: memref<1x8x128xi32, #tpu.memory_space<vmem>>, %arg4: memref<1x3x4x8x128xf32, #tpu.memory_space<vmem>>) attributes {dimension_semantics = [#tpu.dimension_semantics<parallel>, #tpu.dimension_semantics<arbitrary>], iteration_bounds = array<i64: 2, 1>, scalar_prefetch = 0 : i64, scratch_operands = 0 : i64, tpu.core_type = #tpu.core_type<tc>, window_params = [{transform_indices = @transform_0, window_bounds = array<i64: 1, 4, 8, 128>}, {transform_indices = @transform_1, window_bounds = array<i64: 1, 8, 128>}, {transform_indices = @transform_2, window_bounds = array<i64: 1, 3, 4, 8, 128>}]} {
    %c0_i32 = arith.constant 0 : i32
    %0 = arith.cmpi eq, %arg1, %c0_i32 : i32
    %1 = arith.extui %0 : i1 to i32
    %c0_i32_0 = arith.constant 0 : i32
    %2 = arith.cmpi ne, %1, %c0_i32_0 : i32
    scf.if %2 {
      %cst_42 = arith.constant 0.000000e+00 : f32
      %61 = vector.broadcast %cst_42 : f32 to vector<1x3x4x8x128xf32>
      %c0_43 = arith.constant 0 : index
      %c0_44 = arith.constant 0 : index
      %c0_45 = arith.constant 0 : index
      %c0_46 = arith.constant 0 : index
      %c0_47 = arith.constant 0 : index
      %62 = vector.load %arg4[%c0_43, %c0_44, %c0_45, %c0_46, %c0_47] : memref<1x3x4x8x128xf32, #tpu.memory_space<vmem>>, vector<1x3x4x8x128xf32>
      tpu.vector_store %arg4[%c0_43, %c0_44, %c0_45, %c0_46, %c0_47], %61 {strides = array<i32>} : memref<1x3x4x8x128xf32, #tpu.memory_space<vmem>>, vector<1x3x4x8x128xf32>,
    } else {
    }
    %c0 = arith.constant 0 : index
    %c0_1 = arith.constant 0 : index
    %c0_2 = arith.constant 0 : index
    %c0_3 = arith.constant 0 : index
    %3 = vector.load %arg2[%c0, %c0_1, %c0_2, %c0_3] : memref<1x4x8x128xf32, #tpu.memory_space<vmem>>, vector<1x4x8x128xf32>
    %4 = vector.shape_cast %3 : vector<1x4x8x128xf32> to vector<4x8x128xf32>
    %c0_4 = arith.constant 0 : index
    %c0_5 = arith.constant 0 : index
    %c0_6 = arith.constant 0 : index
    %5 = vector.load %arg3[%c0_4, %c0_5, %c0_6] : memref<1x8x128xi32, #tpu.memory_space<vmem>>, vector<1x8x128xi32>
    %6 = vector.shape_cast %5 : vector<1x8x128xi32> to vector<8x128xi32>
    %cst = arith.constant dense<0xFF800000> : vector<8x128xf32>
    %7 = vector.multi_reduction <maximumf>, %4, %cst [0] : vector<4x8x128xf32> to vector<8x128xf32>
    %8 = vector.shape_cast %7 : vector<8x128xf32> to vector<1x8x128xf32>
    %9 = vector.broadcast %8 : vector<1x8x128xf32> to vector<4x8x128xf32>
    %10 = arith.subf %4, %9 : vector<4x8x128xf32>
    %11 = math.exp %10 : vector<4x8x128xf32>
    %cst_7 = arith.constant dense<0.000000e+00> : vector<8x128xf32>
    %12 = vector.multi_reduction <add>, %11, %cst_7 [0] : vector<4x8x128xf32> to vector<8x128xf32>
    %13 = vector.shape_cast %12 : vector<8x128xf32> to vector<1x8x128xf32>
    %14 = vector.broadcast %13 : vector<1x8x128xf32> to vector<4x8x128xf32>
    %15 = arith.divf %11, %14 : vector<4x8x128xf32>
    %c0_i32_8 = arith.constant 0 : i32
    %16 = vector.broadcast %c0_i32_8 : i32 to vector<8x128xi32>
    %17 = arith.cmpi sge, %6, %16 : vector<8x128xi32>
    %c4_i32 = arith.constant 4 : i32
    %18 = vector.broadcast %c4_i32 : i32 to vector<8x128xi32>
    %19 = arith.cmpi slt, %6, %18 : vector<8x128xi32>
    %20 = arith.andi %17, %19 : vector<8x128xi1>
    %21 = tpu.iota {dimensions = array<i32: 0>} : vector<4x8x128xi32>
    %22 = vector.shape_cast %6 : vector<8x128xi32> to vector<1x8x128xi32>
    %23 = vector.broadcast %22 : vector<1x8x128xi32> to vector<4x8x128xi32>
    %24 = arith.cmpi eq, %23, %21 : vector<4x8x128xi32>
    %25 = vector.shape_cast %20 : vector<8x128xi1> to vector<1x8x128xi1>
    %26 = vector.broadcast %25 : vector<1x8x128xi1> to vector<4x8x128xi1>
    %27 = arith.andi %24, %26 : vector<4x8x128xi1>
    %cst_9 = arith.constant 0.000000e+00 : f32
    %28 = vector.shape_cast %25 : vector<1x8x128xi1> to vector<1x8x128xi1>
    %29 = vector.broadcast %28 : vector<1x8x128xi1> to vector<4x8x128xi1>
    %30 = vector.broadcast %cst_9 : f32 to vector<4x8x128xf32>
    %31 = arith.select %29, %15, %30 : vector<4x8x128xi1>, vector<4x8x128xf32>
    %c0_10 = arith.constant 0 : index
    %c0_11 = arith.constant 0 : index
    %c0_12 = arith.constant 0 : index
    %c0_13 = arith.constant 0 : index
    %c0_14 = arith.constant 0 : index
    %32 = vector.load %arg4[%c0_10, %c0_11, %c0_12, %c0_13, %c0_14] : memref<1x3x4x8x128xf32, #tpu.memory_space<vmem>>, vector<1x1x4x8x128xf32>
    %33 = vector.shape_cast %32 : vector<1x1x4x8x128xf32> to vector<4x8x128xf32>
    %cst_15 = arith.constant 0.000000e+00 : f32
    %34 = vector.broadcast %cst_15 : f32 to vector<4x8x128xf32>
    %35 = arith.select %27, %31, %34 : vector<4x8x128xi1>, vector<4x8x128xf32>
    %36 = vector.shape_cast %35 : vector<4x8x128xf32> to vector<4x1x8x128xf32>
    %cst_16 = arith.constant dense<0.000000e+00> : vector<4x8x128xf32>
    %37 = vector.multi_reduction <add>, %36, %cst_16 [1] : vector<4x1x8x128xf32> to vector<4x8x128xf32>
    %38 = arith.addf %33, %37 : vector<4x8x128xf32>
    %c0_17 = arith.constant 0 : index
    %c0_18 = arith.constant 0 : index
    %c0_19 = arith.constant 0 : index
    %c0_20 = arith.constant 0 : index
    %c0_21 = arith.constant 0 : index
    %39 = vector.load %arg4[%c0_17, %c0_18, %c0_19, %c0_20, %c0_21] : memref<1x3x4x8x128xf32, #tpu.memory_space<vmem>>, vector<1x1x4x8x128xf32>
    %40 = vector.shape_cast %39 : vector<1x1x4x8x128xf32> to vector<4x8x128xf32>
    %41 = vector.shape_cast %38 : vector<4x8x128xf32> to vector<1x1x4x8x128xf32>
    tpu.vector_store %arg4[%c0_17, %c0_18, %c0_19, %c0_20, %c0_21], %41 {strides = array<i32>} : memref<1x3x4x8x128xf32, #tpu.memory_space<vmem>>, vector<1x1x4x8x128xf32>,
    %c0_22 = arith.constant 0 : index
    %c1 = arith.constant 1 : index
    %c0_23 = arith.constant 0 : index
    %c0_24 = arith.constant 0 : index
    %c0_25 = arith.constant 0 : index
    %42 = vector.load %arg4[%c0_22, %c1, %c0_23, %c0_24, %c0_25] : memref<1x3x4x8x128xf32, #tpu.memory_space<vmem>>, vector<1x1x4x8x128xf32>
    %43 = vector.shape_cast %42 : vector<1x1x4x8x128xf32> to vector<4x8x128xf32>
    %44 = arith.extui %27 : vector<4x8x128xi1> to vector<4x8x128xi32>
    %45 = arith.sitofp %44 : vector<4x8x128xi32> to vector<4x8x128xf32>
    %46 = vector.shape_cast %45 : vector<4x8x128xf32> to vector<4x1x8x128xf32>
    %cst_26 = arith.constant dense<0.000000e+00> : vector<4x8x128xf32>
    %47 = vector.multi_reduction <add>, %46, %cst_26 [1] : vector<4x1x8x128xf32> to vector<4x8x128xf32>
    %48 = arith.addf %43, %47 : vector<4x8x128xf32>
    %c0_27 = arith.constant 0 : index
    %c1_28 = arith.constant 1 : index
    %c0_29 = arith.constant 0 : index
    %c0_30 = arith.constant 0 : index
    %c0_31 = arith.constant 0 : index
    %49 = vector.load %arg4[%c0_27, %c1_28, %c0_29, %c0_30, %c0_31] : memref<1x3x4x8x128xf32, #tpu.memory_space<vmem>>, vector<1x1x4x8x128xf32>
    %50 = vector.shape_cast %49 : vector<1x1x4x8x128xf32> to vector<4x8x128xf32>
    %51 = vector.shape_cast %48 : vector<4x8x128xf32> to vector<1x1x4x8x128xf32>
    tpu.vector_store %arg4[%c0_27, %c1_28, %c0_29, %c0_30, %c0_31], %51 {strides = array<i32>} : memref<1x3x4x8x128xf32, #tpu.memory_space<vmem>>, vector<1x1x4x8x128xf32>,
    %c0_32 = arith.constant 0 : index
    %c2 = arith.constant 2 : index
    %c0_33 = arith.constant 0 : index
    %c0_34 = arith.constant 0 : index
    %c0_35 = arith.constant 0 : index
    %52 = vector.load %arg4[%c0_32, %c2, %c0_33, %c0_34, %c0_35] : memref<1x3x4x8x128xf32, #tpu.memory_space<vmem>>, vector<1x1x4x8x128xf32>
    %53 = vector.shape_cast %52 : vector<1x1x4x8x128xf32> to vector<4x8x128xf32>
    %54 = arith.mulf %31, %31 : vector<4x8x128xf32>
    %55 = vector.shape_cast %54 : vector<4x8x128xf32> to vector<4x1x8x128xf32>
    %cst_36 = arith.constant dense<0.000000e+00> : vector<4x8x128xf32>
    %56 = vector.multi_reduction <add>, %55, %cst_36 [1] : vector<4x1x8x128xf32> to vector<4x8x128xf32>
    %57 = arith.addf %53, %56 : vector<4x8x128xf32>
    %c0_37 = arith.constant 0 : index
    %c2_38 = arith.constant 2 : index
    %c0_39 = arith.constant 0 : index
    %c0_40 = arith.constant 0 : index
    %c0_41 = arith.constant 0 : index
    %58 = vector.load %arg4[%c0_37, %c2_38, %c0_39, %c0_40, %c0_41] : memref<1x3x4x8x128xf32, #tpu.memory_space<vmem>>, vector<1x1x4x8x128xf32>
    %59 = vector.shape_cast %58 : vector<1x1x4x8x128xf32> to vector<4x8x128xf32>
    %60 = vector.shape_cast %57 : vector<4x8x128xf32> to vector<1x1x4x8x128xf32>
    tpu.vector_store %arg4[%c0_37, %c2_38, %c0_39, %c0_40, %c0_41], %60 {strides = array<i32>} : memref<1x3x4x8x128xf32, #tpu.memory_space<vmem>>, vector<1x1x4x8x128xf32>,
    return
  }
  func.func @transform_0(%arg0: i32, %arg1: i32) -> (i32, i32, i32, i32) {
    %c0_i32 = arith.constant 0 : i32
    %c0_i32_0 = arith.constant 0 : i32
    %c0_i32_1 = arith.constant 0 : i32
    return %arg0, %c0_i32, %arg1, %c0_i32_0 : i32, i32, i32, i32
  }
  func.func @transform_1(%arg0: i32, %arg1: i32) -> (i32, i32, i32) {
    %c0_i32 = arith.constant 0 : i32
    %c0_i32_0 = arith.constant 0 : i32
    return %arg0, %arg1, %c0_i32 : i32, i32, i32
  }
  func.func @transform_2(%arg0: i32, %arg1: i32) -> (i32, i32, i32, i32, i32) {
    %c0_i32 = arith.constant 0 : i32
    %c0_i32_0 = arith.constant 0 : i32
    %c0_i32_1 = arith.constant 0 : i32
    %c0_i32_2 = arith.constant 0 : i32
    %c0_i32_3 = arith.constant 0 : i32
    return %arg0, %c0_i32, %c0_i32_0, %c0_i32_1, %c0_i32_2 : i32, i32, i32, i32, i32
  }
}

</mosaic_0001>

<bundles_post_ra>
// kernel: tpu_custom_call.1
= control target key start
LH: loop header
LB: loop body
LE: loop exit
PB: predicated region body
PF: predicated region fallthrough
CT: control target
= control target key end

     0   :  { %7 = vsyncpa [#allocation3], 0  ;;  %s994_s0 = inlined_call_operand.hbm [shape: f32[2,4,8,128], index: 0, kind: input, shape index: {}]   ;;  %s995_s1 = inlined_call_operand.hbm [shape: s32[2,8,128], index: 1, kind: input, shape index: {}]   ;;  %s996_s2 = inlined_call_operand.hbm [shape: f32[2,3,4,8,128], index: 2, kind: output, shape index: {}]  }
   0x1   :  { %9 = vsyncpa [#allocation3 + $0x1], 0 }
   0x2   :  { %10 = vsyncpa [#allocation6], 0 }
   0x3   :  { %12 = vsyncpa [#allocation6 + $0x1], 0 }
   0x4   :  { %13 = vsyncpa [#allocation4], 0 }
   0x5   :  { %15 = vsyncpa [#allocation4 + $0x1], 0  ;;  %s750_s9 = smov 0   ;;  %s752_s10 = smov 0  }
   0x6   :  { %s754_s11 = smov 0   ;;  %s756_s12 = smov 0  }
   0x7   :  { %s758_s13 = smov 0   ;;  %s760_s14 = smov 0  }
   0x8 LB: > { %s465_s15 = sadd.s32 4294967295, %s725_s14   ;;  %s466_s16 = sadd.s32 4294967294, %s725_s14   ;;  %s725_s14 = sphi %s760_s14, %s21_s14   ;;  %s721_s13 = sphi %s758_s13, %s1017_s13   ;;  %s717_s12 = sphi %s756_s12, %s1016_s12   ;;  %s713_s11 = sphi %s754_s11, %s1015_s11   ;;  %s709_s10 = sphi %s752_s10, %s1014_s10   ;;  %s705_s9 = sphi %s750_s9, %s1013_s9  }
   0x9   : > { %s33_s17 = sadd.s32 1, %s721_s13  ;;  %s42_s18 = sadd.s32 1, %s713_s11 }
   0xa   : > { %p35_p0 = scmp.ge.s32.totalorder %s33_s17, 2  ;;  %p49_p1 = scmp.ne.s32.totalorder %s713_s11, %s709_s10 }
   0xb   : > { %p50_p2 = scmp.eq.s32.totalorder %s725_s14, 0  ;;  %p55_p3 = scmp.ne.s32.totalorder %s709_s10, %s705_s9 }
   0xc   : > { %s1019_s17 = smov (%p35_p0, %s33_s17), 0  ;;  %p56_p5 = scmp.eq.s32.totalorder %s465_s15, 0 }
   0xd   : > { %p791_p4 = por %p50_p2, %p49_p1  ;;  %s37_s20 = ssub.s32 %s721_s13, %s1019_s17 }
   0xe   : > { %p107_p6 = scmp.eq.s32.totalorder %s465_s15, 1  ;;  %p40_p7 = scmp.eq.s32.totalorder %s37_s20, 0 }
   0xf   : > { %p797_p8 = por %p56_p5, %p55_p3  ;;  %p113_p10 = scmp.eq.s32.totalorder %s466_s16, 1 }
  0x10   : > { %p801_p9 = por %p107_p6, %p49_p1  ;;  %p468_p12 = scmp.ge.s32.totalorder %s725_s14, 2 }
  0x11   : > { %s806_s23 = scalar_select %p40_p7, %s713_s11, %s42_s18  }
  0x12   : > { %p808_p11 = por %p113_p10, %p55_p3  ;;  %p520_p13 = scmp.lt.s32.totalorder %s725_s14, 2 }
  0x13   : > { %s815_s25 = sand.u32 1, %s713_s11   ;;  %s500_s27 = sshll.u32 %s721_s13, 9 }
  0x14   : > { %s469_s26 = sshll.u32 %s815_s25, 5  ;;  %s144_s30 = scalar_lea.hbm %s994_s0, %s500_s27 }
  0x15   : > { %s137_s3 = scalar_lea.vmem [#allocation2], %s469_s26  ;;  %p824_p0 = pnand %p520_p13, %p791_p4 }
  0x16   : > { %s145_s4 = sshll.u32 %s137_s3, 4  ;;  %p474_p1 = scmp.ge.s32.totalorder %s725_s14, 1  ;;  %s146_s4 = int_to_ptr.vmem [resolvable:$true] %s145_s4 }
  0x17   : > { %s134_s6 = scalar_lea.sflag [#allocation3], %s815_s25  ;;  %p587_p2 = pneg %p824_p0 }
  0x18   : > { %s598_s7 = scalar_lea.vmem %s146_s4, 512  ;;  %s727_s8 = smov [#allocation2]  }
  0x19   : > { %p599_p3 = scmp.ne.s32.totalorder %s146_s4, %s598_s7  ;;  %s603_s15 = sshll.u32 %s727_s8, 4  ;;  %s604_s15 = int_to_ptr.vmem [resolvable:$false] %s603_s15 }
  0x1a   : > { %s605_s16 = scalar_lea.vmem %s604_s15, 1024  ;;  %p606_p4 = scmp.lt.s32.totalorder %s146_s4, %s604_s15 }
  0x1b   : > { %p601_p5 = pnand %p599_p3, %p587_p2  ;;  %p607_p7 = scmp.lt.s32.totalorder %s605_s16, %s598_s7 }
  0x1d   : > { %p602_p6 = pneg %p601_p5  ;;  %p608_p10 = por %p607_p7, %p606_p4 }
  0x1f   : > { %p609_p13 = pnand %p608_p10, %p602_p6 }
  0x21   : > { %612 = shalt.err (!%p609_p13)
}
  0x22   : > { %s728_s18 = smov 128   ;;  %s729_s19 = smov 8  }
  0x23   : > { %512 = dma.hbm_to_vmem [thread:$0]  (!%p824_p0), %s144_s30, 512, %s146_s4, %s134_s6, %s728_s18, %s728_s18, %s729_s19  }
  0x24   : > { %p172_p3 = scmp.lt.s32.totalorder %s725_s14, 3  ;;  %s472_s20 = sshll.u32 %s815_s25, 3 }
  0x25   : > { %s473_s26 = sshll.u32 %s721_s13, 7  ;;  %s159_s7 = scalar_lea.vmem [#allocation5], %s472_s20 }
  0x26   : > { %p842_p5 = pnand %p474_p1, %p172_p3  ;;  %s165_s3 = scalar_lea.hbm %s995_s1, %s473_s26 }
  0x27   : > { %s167_s8 = sshll.u32 %s159_s7, 4  ;;  %s156_s15 = scalar_lea.sflag [#allocation6], %s815_s25  ;;  %s168_s8 = int_to_ptr.vmem [resolvable:$true] %s167_s8 }
  0x28   : > { %s626_s16 = scalar_lea.vmem %s168_s8, 128  ;;  %s730_s30 = smov [#allocation5]  }
  0x29   : > { %p627_p6 = scmp.ne.s32.totalorder %s168_s8, %s626_s16  ;;  %s631_s4 = sshll.u32 %s730_s30, 4  ;;  %s632_s4 = int_to_ptr.vmem [resolvable:$false] %s631_s4 }
  0x2a   : > { %s633_s6 = scalar_lea.vmem %s632_s4, 256  ;;  %p634_p1 = scmp.lt.s32.totalorder %s168_s8, %s632_s4 }
  0x2b   : > { %p629_p4 = pnand %p627_p6, %p587_p2  ;;  %p635_p10 = scmp.lt.s32.totalorder %s633_s6, %s626_s16 }
  0x2d   : > { %p630_p7 = pneg %p629_p4  ;;  %p636_p13 = por %p635_p10, %p634_p1 }
  0x2f   : > { %p637_p3 = pnand %p636_p13, %p630_p7 }
  0x31   : > { %640 = shalt.err (!%p637_p3)
}
  0x32   : > { %515 = dma.hbm_to_vmem [thread:$0]  (!%p824_p0), %s165_s3, 128, %s168_s8, %s156_s15  }
  0x33   : > { %176 = sbr.rel (%p842_p5) target bundleno = 127 (0x7f), region = 28  ;;  %s858_s25 = sand.u32 (!%p842_p5), 1, %s709_s10  }
  0x34   : > { %s475_s18 = sshll.u32 (!%p842_p5), %s858_s25, 5  ;;  %s179_s19 = scalar_lea.sflag (!%p842_p5), [#allocation3], %s858_s25 }
  0x35   : > { %s182_s20 = scalar_lea.vmem (!%p842_p5), [#allocation2], %s475_s18 }
  0x38   : > { %692 = dma.done.wait (%p797_p8), %s179_s19, 512  }
  0x39   : > { %694 = vsyncadd (%p797_p8), %s179_s19, 4294966784  ;;  %s476_s5 = sshll.u32 %s858_s25, 3  ;;  %s188_s26 = scalar_lea.sflag [#allocation6], %s858_s25 }
  0x3a   : > { %s191_s27 = scalar_lea.vmem [#allocation5], %s476_s5 }
  0x3b   : > { %696 = dma.done.wait (%p797_p8), %s188_s26, 128  }
  0x3c   : > { %698 = vsyncadd (%p797_p8), %s188_s26, 4294967168  ;;  %v233_v0 = vld [vmem:[%s182_s20] sm:$0xff]  ;;  %v234_v1 = vld [vmem:[%s182_s20 + $0x8] sm:$0xff]  ;;  %s501_s28 = smul.u32 96, %s858_s25  ;;  %v731_v11 = vmov 0.0   ;;  %s732_s30 = smov [#allocation7]  }
  0x3d   : > { %v235_v2 = vld [vmem:[%s182_s20 + $0x10] sm:$0xff]  ;;  %v236_v3 = vld [vmem:[%s182_s20 + $0x18] sm:$0xff]  ;;  %v237_v4 = vld [vmem:[%s191_s27] sm:$0xff]  ;;  %v238_v5 = vmax.f32 %v233_v0, %v234_v1  ;;  %s502_s29 = smul.u32 1536, %s717_s12  ;;  %s345_s12 = scalar_lea.sflag [#allocation4], %s858_s25 }
  0x3e   : > { %v239_v6 = vmax.f32 %v235_v2, %v236_v3  ;;  %vm261_vm0 = vcmp.ge.s32.totalorder %v237_v4, 0  ;;  %vm262_vm1 = vcmp.lt.s32.totalorder %v237_v4, 4  ;;  %vm264_vm2 = vcmp.eq.s32.totalorder %v237_v4, 0  ;;  %s907_s21 = scalar_lea.vmem [#allocation7], %s501_s28  ;;  %s645_s4 = sshll.u32 %s732_s30, 4  ;;  %s646_s4 = int_to_ptr.vmem [resolvable:$false] %s645_s4 }
  0x3f   : > { %vm873_vm3 = vmand %vm261_vm0, %vm262_vm1  ;;  %vm265_vm4 = vcmp.eq.s32.totalorder %v237_v4, 1  ;;  %vm266_vm5 = vcmp.eq.s32.totalorder %v237_v4, 2  ;;  %vm267_vm7 = vcmp.eq.s32.totalorder %v237_v4, 3  ;;  %s358_s3 = sshll.u32 %s907_s21, 4  ;;  %s940_s15 = scalar_lea.hbm %s996_s2, %s502_s29  ;;  %s942_s3 = int_to_ptr.vmem [resolvable:$true] %s358_s3 }
  0x40   : > { %v240_v8 = vmax.f32 %v238_v5, %v239_v6  ;;  %vm879_vm6 = vmand %vm264_vm2, %vm873_vm3  ;;  %s641_s16 = scalar_lea.vmem %s942_s3, 1536  ;;  %s647_s6 = scalar_lea.vmem %s646_s4, 3072 }
  0x41   : > { %vm885_vm8 = vmand %vm265_vm4, %vm873_vm3  ;;  %v481_v12 = vsel %vm879_vm6, 1.0, %v731_v11  ;;  %p642_p8 = scmp.ne.s32.totalorder %s942_s3, %s641_s16  ;;  %p648_p5 = scmp.lt.s32.totalorder %s942_s3, %s646_s4 }
  0x42   : > { %v241_v13 = vsub.f32 %v233_v0, %v240_v8  ;;  %v242_v14 = vsub.f32 %v234_v1, %v240_v8  ;;  %v243_v15 = vsub.f32 %v235_v2, %v240_v8  ;;  %v244_v16 = vsub.f32 %v236_v3, %v240_v8  ;;  %vm893_vm9 = vmand %vm266_vm5, %vm873_vm3  ;;  %485 = vst [vmem:[%s907_s21 + $0x20] sm:$0xff] %v481_v12  ;;  %p649_p6 = scmp.lt.s32.totalorder %s647_s6, %s641_s16 }
  0x43   : > { %vm899_vm10 = vmand %vm267_vm7, %vm873_vm3  ;;  %v482_v19 = vsel %vm885_vm8, 1.0, %v731_v11  ;;  %v483_v20 = vsel %vm893_vm9, 1.0, %v731_v11  ;;  %p643_p0 = pnand %p642_p8, %p801_p9 }
  0x44   : > { %v245_v21 = vmul.f32 1.442695, %v241_v13  ;;  %v247_v22 = vmul.f32 1.442695, %v242_v14  ;;  %v249_v23 = vmul.f32 1.442695, %v243_v15  ;;  %p650_p4 = por %p649_p6, %p648_p5 }
  0x45   : > { %v251_v24 = vmul.f32 1.442695, %v244_v16  ;;  %v484_v25 = vsel %vm899_vm10, 1.0, %v731_v11  ;;  %486 = vst [vmem:[%s907_s21 + $0x28] sm:$0xff] %v482_v19  ;;  %487 = vst [vmem:[%s907_s21 + $0x30] sm:$0xff] %v483_v20  ;;  %p644_p2 = pneg %p643_p0 }
  0x46   : > { %575 = vpow2.f32 %v245_v21  ;;  %488 = vst [vmem:[%s907_s21 + $0x38] sm:$0xff] %v484_v25 }
  0x47   : > { %577 = vpow2.f32 %v247_v22  ;;  %p651_p7 = pnand %p650_p4, %p644_p2 }
  0x48   : > { %579 = vpow2.f32 %v249_v23 }
  0x49   : > { %581 = vpow2.f32 %v251_v24 }
  0x53   : > { %v576_v26 = vpop.eup %575 }
  0x54   : > { %v578_v27 = vpop.eup %577 }
  0x55   : > { %v580_v28 = vpop.eup %579  ;;  %v253_v29 = vadd.f32 %v578_v27, %v576_v26 }
  0x56   : > { %v582_v30 = vpop.eup %581 }
  0x57   : > { %v254_v31 = vadd.f32 %v580_v28, %v253_v29 }
  0x59   : > { %v255_v32 = vadd.f32 %v582_v30, %v254_v31 }
  0x5b   : > { %583 = vrcp.f32 %v255_v32 }
  0x68   : > { %v584_v33 = vpop.eup %583 }
  0x69   : > { %v257_v34 = vmul.f32 %v584_v33, %v576_v26  ;;  %v258_v35 = vmul.f32 %v584_v33, %v578_v27  ;;  %v259_v36 = vmul.f32 %v584_v33, %v580_v28  ;;  %v260_v37 = vmul.f32 %v584_v33, %v582_v30 }
  0x6b   : > { %v274_v38 = vsel %vm873_vm3, %v257_v34, 0.0  ;;  %v275_v39 = vsel %vm873_vm3, %v258_v35, 0.0  ;;  %v276_v40 = vsel %vm873_vm3, %v259_v36, 0.0  ;;  %v277_v41 = vsel %vm873_vm3, %v260_v37, 0.0 }
  0x6c   : > { %v282_v42 = vsel %vm879_vm6, %v274_v38, 0.0  ;;  %v283_v43 = vsel %vm885_vm8, %v275_v39, 0.0  ;;  %v284_v44 = vsel %vm893_vm9, %v276_v40, 0.0  ;;  %v285_v45 = vsel %vm899_vm10, %v277_v41, 0.0 }
  0x6d   : > { %v328_v46 = vmul.f32 %v274_v38, %v274_v38  ;;  %v329_v47 = vmul.f32 %v275_v39, %v275_v39  ;;  %v330_v48 = vmul.f32 %v276_v40, %v276_v40  ;;  %v331_v49 = vmul.f32 %v277_v41, %v277_v41  ;;  %294 = vst [vmem:[%s907_s21] sm:$0xff] %v282_v42 }
  0x6e   : > { %295 = vst [vmem:[%s907_s21 + $0x8] sm:$0xff] %v283_v43  ;;  %296 = vst [vmem:[%s907_s21 + $0x10] sm:$0xff] %v284_v44 }
  0x6f   : > { %297 = vst [vmem:[%s907_s21 + $0x18] sm:$0xff] %v285_v45  ;;  %493 = vst [vmem:[%s907_s21 + $0x40] sm:$0xff] %v328_v46 }
  0x70   : > { %494 = vst [vmem:[%s907_s21 + $0x48] sm:$0xff] %v329_v47  ;;  %495 = vst [vmem:[%s907_s21 + $0x50] sm:$0xff] %v330_v48 }
  0x71   : > { %496 = vst [vmem:[%s907_s21 + $0x58] sm:$0xff] %v331_v49 }
  0x72   : > { %654 = shalt.err (!%p651_p7)
}
  0x73   : > { %s655_s18 = scalar_lea.hbm %s940_s15, 1536  ;;  %s659_s5 = scalar_lea.hbm %s996_s2, 3072 }
  0x74   : > { %p656_p1 = scmp.ne.s32.totalorder %s940_s15, %s655_s18  ;;  %p660_p3 = scmp.lt.s32.totalorder %s940_s15, %s996_s2 }
  0x75   : > { %p661_p8 = scmp.lt.s32.totalorder %s659_s5, %s655_s18 }
  0x76   : > { %p657_p10 = pnand %p656_p1, %p801_p9 }
  0x77   : > { %p662_p0 = por %p661_p8, %p660_p3 }
  0x78   : > { %p658_p13 = pneg %p657_p10 }
  0x7a   : > { %p663_p2 = pnand %p662_p0, %p658_p13 }
  0x7c   : > { %666 = shalt.err (!%p663_p2)
}
  0x7d   : > { %s733_s28 = smov 128   ;;  %s734_s21 = smov 8  }
  0x7e   : > { %507 = dma.vmem_to_hbm [thread:$0]  (%p801_p9), %s942_s3, 1536, %s940_s15, %s345_s12, %s733_s28, %s733_s28, %s734_s21  }
  0x7f PF: > { %s373_s29 = sand.u32 1, %s705_s9   ;;  %p517_p5 = pnand %p468_p12, %p808_p11 }
  0x80   : > { %s374_s7 = scalar_lea.sflag [#allocation4], %s373_s29 }
  0x81   : > { %p518_p6 = pneg %p517_p5 }
  0x83   : > { %700 = dma.done.wait (%p518_p6), %s374_s7, 1536  }
  0x84   : > { %702 = vsyncadd (%p518_p6), %s374_s7, 4294965760  ;;  %s21_s14 = sadd.s32 1, %s725_s14   ;;  %s1013_s9 = smov %s709_s10 }
  0x85   : > { %p18_p4 = scmp.ge.s32.totalorder %s21_s14, 4   ;;  %s1014_s10 = smov %s713_s11 }
  0x86   : > { %s1015_s11 = smov %s806_s23  ;;  %s1016_s12 = smov %s721_s13 }
  0x87   : > { %s1017_s13 = smov %s1019_s17  ;;  %20 = sbr.rel (!%p18_p4) target bundleno = 8 (0x8), region = 92 }
  0x8c   :  { %379 = vsyncpa [#allocation3], 1 }
  0x8d   :  { %381 = vsyncpa [#allocation3 + $0x1], 1 }
  0x8e   :  { %382 = vsyncpa [#allocation6], 1 }
  0x8f   :  { %384 = vsyncpa [#allocation6 + $0x1], 1 }
  0x90   :  { %385 = vsyncpa [#allocation4], 1 }
  0x91   :  { %387 = vsyncpa [#allocation4 + $0x1], 1 }

</bundles_post_ra>
